<compile_context>
chip_gen: v7x
topology: tpu7x:2x2x1
jax: 0.10.0
libtpu: 0.0.40
codegen_flags: <defaults>
</compile_context>

<pallas_src>
import functools
import math
from types import SimpleNamespace

import jax
import jax.numpy as jnp
from jax.experimental import pallas as pl
from jax.experimental.pallas import tpu as pltpu

BN_EPS = 1e-5
MATMUL_DTYPE = jnp.bfloat16   # MXU operand dtype; accumulation stays float32
TM_MAX = 256                  # row-tile size (multiple of 16 for bf16 packing)

_PARALLEL = pltpu.CompilerParams(dimension_semantics=("parallel",))


def _gelu(x):
    # qagnn's GELU (BERT/GPT tanh approximation) — f32 epilogue math
    return 0.5 * x * (1.0 + jnp.tanh(math.sqrt(2.0 / math.pi) * (x + 0.044715 * x ** 3)))


def _round_up(x, m):
    return (x + m - 1) // m * m


def _tile_rows(m):
    tm = min(TM_MAX, _round_up(m, 16))
    return tm, _round_up(m, tm)


def _pad_rows(x, rows):
    m = x.shape[0]
    if m == rows:
        return x
    return jnp.pad(x, ((0, rows - m), (0, 0)))


def _row_spec(tm, k):
    return pl.BlockSpec((tm, k), lambda i: (i, 0))


def _fixed_spec(shape):
    return pl.BlockSpec(shape, lambda i: (0, 0))


# ----------------------------------------------------------------------------
# Pallas kernels
# ----------------------------------------------------------------------------
def _linear_kernel(x_ref, w_ref, b_ref, o_ref, *, act):
    y = jnp.dot(x_ref[...], w_ref[...], preferred_element_type=jnp.float32) + b_ref[...]
    if act == "gelu":
        y = _gelu(y)
    elif act == "relu":
        y = jnp.maximum(y, 0.0)
    o_ref[...] = y


def pallas_linear(x, w, b, act="none"):
    M, K = x.shape
    N = w.shape[1]
    tm, Mp = _tile_rows(M)
    out = pl.pallas_call(
        functools.partial(_linear_kernel, act=act),
        grid=(Mp // tm,),
        in_specs=[_row_spec(tm, K), _fixed_spec((K, N)), _fixed_spec((1, N))],
        out_specs=_row_spec(tm, N),
        out_shape=jax.ShapeDtypeStruct((Mp, N), jnp.float32),
        compiler_params=_PARALLEL,
    )(_pad_rows(x, Mp).astype(MATMUL_DTYPE), w.astype(MATMUL_DTYPE),
      b.reshape(1, N).astype(jnp.float32))
    return out[:M]


def _mlp2_kernel(x_ref, w1_ref, b1_ref, w2_ref, b2_ref, o_ref, *, bn_scale, out_act):
    h = jnp.dot(x_ref[...], w1_ref[...], preferred_element_type=jnp.float32) + b1_ref[...]
    # eval-mode BatchNorm1d (running mean=0, var=1, gamma=1, beta=0) then ReLU
    h = jnp.maximum(h * bn_scale, 0.0)
    y = jnp.dot(h.astype(x_ref.dtype), w2_ref[...],
                preferred_element_type=jnp.float32) + b2_ref[...]
    if out_act == "gelu":
        y = _gelu(y)
    o_ref[...] = y


def pallas_mlp2(x, w1, b1, w2, b2, out_act="none"):
    M, K = x.shape
    Hd = w1.shape[1]
    N = w2.shape[1]
    tm, Mp = _tile_rows(M)
    bn_scale = 1.0 / math.sqrt(1.0 + BN_EPS)
    out = pl.pallas_call(
        functools.partial(_mlp2_kernel, bn_scale=bn_scale, out_act=out_act),
        grid=(Mp // tm,),
        in_specs=[_row_spec(tm, K), _fixed_spec((K, Hd)), _fixed_spec((1, Hd)),
                  _fixed_spec((Hd, N)), _fixed_spec((1, N))],
        out_specs=_row_spec(tm, N),
        out_shape=jax.ShapeDtypeStruct((Mp, N), jnp.float32),
        compiler_params=_PARALLEL,
    )(_pad_rows(x, Mp).astype(MATMUL_DTYPE), w1.astype(MATMUL_DTYPE),
      b1.reshape(1, Hd).astype(jnp.float32), w2.astype(MATMUL_DTYPE),
      b2.reshape(1, N).astype(jnp.float32))
    return out[:M]


def _dual_linear_gelu_kernel(h_ref, x_ref, wh_ref, bh_ref, wx_ref, bx_ref, o_ref):
    y = (jnp.dot(h_ref[...], wh_ref[...], preferred_element_type=jnp.float32) + bh_ref[...]
         + jnp.dot(x_ref[...], wx_ref[...], preferred_element_type=jnp.float32) + bx_ref[...])
    o_ref[...] = _gelu(y)


def pallas_dual_linear_gelu(h, x, wh, bh, wx, bx):
    M, Kh = h.shape
    Kx = x.shape[1]
    N = wh.shape[1]
    tm, Mp = _tile_rows(M)
    out = pl.pallas_call(
        _dual_linear_gelu_kernel,
        grid=(Mp // tm,),
        in_specs=[_row_spec(tm, Kh), _row_spec(tm, Kx),
                  _fixed_spec((Kh, N)), _fixed_spec((1, N)),
                  _fixed_spec((Kx, N)), _fixed_spec((1, N))],
        out_specs=_row_spec(tm, N),
        out_shape=jax.ShapeDtypeStruct((Mp, N), jnp.float32),
        compiler_params=_PARALLEL,
    )(_pad_rows(h, Mp).astype(MATMUL_DTYPE), _pad_rows(x, Mp).astype(MATMUL_DTYPE),
      wh.astype(MATMUL_DTYPE), bh.reshape(1, N).astype(jnp.float32),
      wx.astype(MATMUL_DTYPE), bx.reshape(1, N).astype(jnp.float32))
    return out[:M]


def _gat_message_kernel(xi_ref, xj_ref, ni_ref, nj_ref, ea_ref,
                        wkx_ref, wkn_ref, wke_ref,
                        wmx_ref, wmn_ref, wme_ref,
                        wqx_ref, wqn_ref,
                        bk_ref, bm_ref, bq_ref,
                        msg_ref, qk_ref, *, inv_sqrt_d):
    f32 = jnp.float32
    xi = xi_ref[...]
    xj = xj_ref[...]
    ni = ni_ref[...]
    nj = nj_ref[...]
    ea = ea_ref[...]
    # linear_key(cat([x_i, nfe_i, edge_attr]))  — weight split over the concat
    key = (jnp.dot(xi, wkx_ref[...], preferred_element_type=f32)
           + jnp.dot(ni, wkn_ref[...], preferred_element_type=f32)
           + jnp.dot(ea, wke_ref[...], preferred_element_type=f32) + bk_ref[...])
    # linear_msg(cat([x_j, nfe_j, edge_attr]))
    msg = (jnp.dot(xj, wmx_ref[...], preferred_element_type=f32)
           + jnp.dot(nj, wmn_ref[...], preferred_element_type=f32)
           + jnp.dot(ea, wme_ref[...], preferred_element_type=f32) + bm_ref[...])
    # linear_query(cat([x_j, nfe_j])) / sqrt(dim_per_head)
    qry = (jnp.dot(xj, wqx_ref[...], preferred_element_type=f32)
           + jnp.dot(nj, wqn_ref[...], preferred_element_type=f32)
           + bq_ref[...]) * inv_sqrt_d
    msg_ref[...] = msg
    # lane-dense (tm, d) output; per-head (query*key).sum reduction done in glue
    qk_ref[...] = qry * key


def pallas_gat_message(x_i, x_j, nfe_i, nfe_j, edge_attr, lp, dim_per_head):
    E2, d = x_i.shape
    tm, Mp = _tile_rows(E2)
    rs = _row_spec(tm, d)
    ws = _fixed_spec((d, d))
    bsp = _fixed_spec((1, d))
    pad = lambda a: _pad_rows(a, Mp).astype(MATMUL_DTYPE)
    msg, qk = pl.pallas_call(
        functools.partial(_gat_message_kernel, inv_sqrt_d=1.0 / math.sqrt(dim_per_head)),
        grid=(Mp // tm,),
        in_specs=[rs] * 5 + [ws] * 8 + [bsp] * 3,
        out_specs=(rs, rs),
        out_shape=(jax.ShapeDtypeStruct((Mp, d), jnp.float32),
                   jax.ShapeDtypeStruct((Mp, d), jnp.float32)),
        compiler_params=_PARALLEL,
    )(pad(x_i), pad(x_j), pad(nfe_i), pad(nfe_j), pad(edge_attr),
      lp["wk_x"].astype(MATMUL_DTYPE), lp["wk_n"].astype(MATMUL_DTYPE), lp["wk_e"].astype(MATMUL_DTYPE),
      lp["wm_x"].astype(MATMUL_DTYPE), lp["wm_n"].astype(MATMUL_DTYPE), lp["wm_e"].astype(MATMUL_DTYPE),
      lp["wq_x"].astype(MATMUL_DTYPE), lp["wq_n"].astype(MATMUL_DTYPE),
      lp["bk"].reshape(1, d).astype(jnp.float32),
      lp["bm"].reshape(1, d).astype(jnp.float32),
      lp["bq"].reshape(1, d).astype(jnp.float32))
    return msg[:E2], qk[:E2]


# ----------------------------------------------------------------------------
# Model (plain-JAX glue for data-dependent indexing, calling the Pallas kernels)
# ----------------------------------------------------------------------------
def gatconv_layer(lp, x, src, tgt, edge_emb, nfe_src, nfe_tgt, N, cfg):
    d = cfg.concept_dim
    H = cfg.head_count
    D = d // H
    x_i = x[tgt]     # target-node features (PyG flow: x_i = x[edge_index[1]])
    x_j = x[src]     # source-node features
    msg, qk = pallas_gat_message(x_i, x_j, nfe_tgt, nfe_src, edge_emb, lp, D)
    scores = qk.reshape(-1, H, D).sum(axis=2)                       # (E', heads)
    # torch_geometric softmax grouped by source node (scale_att_wei_to_tgt=False)
    smax = jax.ops.segment_max(scores, src, num_segments=N)
    ex = jnp.exp(scores - smax[src])
    ssum = jax.ops.segment_sum(ex, src, num_segments=N)
    alpha = ex / (ssum[src] + 1e-16)
    # per-head broadcast multiply + scatter-add to targets (O(E'*d), no dense one-hot)
    weighted = (msg.reshape(-1, H, D) * alpha[:, :, None]).reshape(-1, d)
    aggr = jax.ops.segment_sum(weighted, tgt, num_segments=N)
    # GATConvE.mlp (Linear-BN-ReLU-Linear) fused with mp_helper's GELU activation
    return pallas_mlp2(aggr, lp["mlp_w1"], lp["mlp_b1"], lp["mlp_w2"], lp["mlp_b2"],
                       out_act="gelu")


def gnn_message_passing(p, cfg, H, edge_index, edge_type, node_type_ids, node_scores):
    B, n_node, d = H.shape
    hidden = d
    N = B * n_node
    _node_type = node_type_ids.reshape(-1)

    T = jax.nn.one_hot(_node_type, cfg.n_ntype, dtype=jnp.float32)
    node_type_emb = pallas_linear(T, p["emb_node_type_w"], p["emb_node_type_b"], act="gelu")

    js = jnp.power(1.1, jnp.arange(hidden // 2, dtype=jnp.float32))[None, None, :]
    Bsin = jnp.sin(js * node_scores)                                 # (B, n, hidden//2)
    node_score_emb = pallas_linear(Bsin.reshape(N, hidden // 2),
                                   p["emb_score_w"], p["emb_score_b"], act="gelu")

    _X = H.reshape(N, d)
    nfe = jnp.concatenate([node_type_emb, node_score_emb], axis=1)   # (N, hidden)

    # edge features (self_loop=True branch)
    e_src, e_tgt = edge_index[0], edge_index[1]
    edge_vec = jax.nn.one_hot(edge_type, cfg.n_etype + 1, dtype=jnp.float32)
    self_edge_vec = jnp.zeros((N, cfg.n_etype + 1), jnp.float32).at[:, cfg.n_etype].set(1.0)
    head_vec = jax.nn.one_hot(_node_type[e_src], cfg.n_ntype, dtype=jnp.float32)
    tail_vec = jax.nn.one_hot(_node_type[e_tgt], cfg.n_ntype, dtype=jnp.float32)
    headtail_vec = jnp.concatenate([head_vec, tail_vec], axis=1)
    self_hv = jax.nn.one_hot(_node_type, cfg.n_ntype, dtype=jnp.float32)
    self_headtail_vec = jnp.concatenate([self_hv, self_hv], axis=1)
    edge_feat = jnp.concatenate(
        [jnp.concatenate([edge_vec, self_edge_vec], axis=0),
         jnp.concatenate([headtail_vec, self_headtail_vec], axis=0)], axis=1)
    # shared edge_encoder (Linear-BN-ReLU-Linear); identical every layer -> computed once
    edge_emb = pallas_mlp2(edge_feat, p["ee_w1"], p["ee_b1"], p["ee_w2"], p["ee_b2"])

    loop_index = jnp.arange(N, dtype=edge_index.dtype)
    src = jnp.concatenate([e_src, loop_index])
    tgt = jnp.concatenate([e_tgt, loop_index])

    # hoist the static node_feature_extra gathers out of the k-layer loop
    nfe_src = nfe[src]
    nfe_tgt = nfe[tgt]

    _Xk = _X
    for layer in range(cfg.k):
        _Xk = gatconv_layer(p["gnn_layers"][layer], _Xk, src, tgt, edge_emb,
                            nfe_src, nfe_tgt, N, cfg)
        # dropout: identity in eval mode

    # output = GELU(Vh(H) + Vx(X)); dropout identity
    out = pallas_dual_linear_gelu(H.reshape(N, d), _Xk,
                                  p["Vh_w"], p["Vh_b"], p["Vx_w"], p["Vx_b"])
    return out.reshape(B, n_node, d)


def pooler(p, cfg, sent_vecs, gnn_output, mask):
    Bq, l, d = gnn_output.shape
    Hh = cfg.n_attention_head
    dk = d // Hh
    # tiny Q projection (Bq rows): leave to XLA
    qs = (sent_vecs @ p["pool_wq"] + p["pool_bq"]).reshape(Bq, Hh, dk)
    k2 = gnn_output.reshape(Bq * l, d)
    # fused K/V projection — one pass over k2 instead of two
    wkv = jnp.concatenate([p["pool_wk"], p["pool_wv"]], axis=1)
    bkv = jnp.concatenate([p["pool_bk"], p["pool_bv"]], axis=0)
    kv = pallas_linear(k2, wkv, bkv)
    ks = kv[:, :Hh * dk].reshape(Bq, l, Hh, dk)
    vs = kv[:, Hh * dk:].reshape(Bq, l, Hh, dk)
    attn = jnp.einsum("bhd,blhd->bhl", qs, ks) / math.sqrt(dk)
    attn = jnp.where(mask[:, None, :], -jnp.inf, attn)
    attn = jax.nn.softmax(attn, axis=-1)
    out = jnp.einsum("bhl,blhd->bhd", attn, vs).reshape(Bq, Hh * dk)
    return out, attn


def qagnn_decoder(p, cfg, sent_vecs, concept_ids, node_type_ids, node_scores,
                  adj_lengths, edge_index, edge_type):
    Bq, n_node = node_type_ids.shape
    d = cfg.concept_dim

    # svec2nvec + GELU: trivially small (Bq rows) — leave to XLA
    gnn_input0 = _gelu(sent_vecs @ p["svec2nvec_w"] + p["svec2nvec_b"])[:, None, :]
    gnn_input1 = p["concept_emb"][concept_ids[:, 1:] - 1]            # embedding lookup
    gnn_input = jnp.concatenate([gnn_input0, gnn_input1], axis=1)    # dropout_e identity

    # node-score normalization
    _mask = (jnp.arange(n_node)[None, :] < adj_lengths[:, None]).astype(jnp.float32)
    ns = -node_scores
    ns = ns - ns[:, 0:1, :]
    ns = ns[:, :, 0] * _mask
    mean_norm = jnp.abs(ns).sum(axis=1) / adj_lengths.astype(jnp.float32)
    ns = ns / (mean_norm[:, None] + 1e-5)
    node_scores_n = ns[:, :, None]

    gnn_output = gnn_message_passing(p, cfg, gnn_input, edge_index, edge_type,
                                     node_type_ids, node_scores_n)
    Z_vecs = gnn_output[:, 0]

    mask = jnp.arange(n_node)[None, :] >= adj_lengths[:, None]
    mask = mask | (node_type_ids == 3)
    all_masked = jnp.all(mask, axis=1)
    mask = mask.at[:, 0].set(mask[:, 0] & ~all_masked)

    graph_vecs, _pool_attn = pooler(p, cfg, sent_vecs, gnn_output, mask)

    # sen_fc / gra_fc: N=1 output columns — cheaper as plain XLA ops
    sen_sco = sent_vecs @ p["sen_fc_w"] + p["sen_fc_b"]
    gra_sco = jnp.concatenate([graph_vecs, Z_vecs], axis=1) @ p["gra_fc_w"] + p["gra_fc_b"]
    logits = sen_sco + gra_sco
    return logits, (sen_sco, gra_sco)


def batch_graph(edge_index_list, edge_type_list, n_nodes):
    ei = [e + i * n_nodes for i, e in enumerate(edge_index_list)]
    return jnp.concatenate(ei, axis=1), jnp.concatenate(edge_type_list, axis=0)


def lm_qagnn_forward(p, cfg, sent_vecs, concept_ids, node_type_ids, node_scores,
                     adj_lengths, edge_index_list, edge_type_list):
    bs, nc = sent_vecs.shape[0], sent_vecs.shape[1]
    n_node = concept_ids.shape[2]
    sv = sent_vecs.reshape(bs * nc, -1)
    ci = concept_ids.reshape(bs * nc, n_node)
    nt = node_type_ids.reshape(bs * nc, n_node)
    ns = node_scores.reshape(bs * nc, n_node, 1)
    al = adj_lengths.reshape(bs * nc)
    edge_index, edge_type = batch_graph(edge_index_list, edge_type_list, n_node)
    # TODO(synk): TextEncoder (pretrained HF LM) has no clean Pallas equivalent;
    # sent_vecs are supplied directly as the encoder output.
    logits, (sen_sco, gra_sco) = qagnn_decoder(p, cfg, sv, ci, nt, ns, al,
                                               edge_index, edge_type)
    return logits.reshape(bs, nc), [sen_sco.reshape(bs, nc), gra_sco.reshape(bs, nc)]


# ----------------------------------------------------------------------------
# Deterministic parameter init (synthetic)
# ----------------------------------------------------------------------------
def init_params(key, cfg):
    d = cfg.concept_dim

    def nrm(k, shape):
        return jax.random.normal(k, shape, jnp.float32) * 0.02

    keys = iter(jax.random.split(key, 64))
    p = {}
    p["svec2nvec_w"] = nrm(next(keys), (cfg.sent_dim, d)); p["svec2nvec_b"] = jnp.zeros((d,))
    p["concept_emb"] = nrm(next(keys), (cfg.n_concept + 2, d))
    p["emb_node_type_w"] = nrm(next(keys), (cfg.n_ntype, d // 2)); p["emb_node_type_b"] = jnp.zeros((d // 2,))
    p["emb_score_w"] = nrm(next(keys), (d // 2, d // 2)); p["emb_score_b"] = jnp.zeros((d // 2,))
    ee_in = cfg.n_etype + 1 + 2 * cfg.n_ntype
    p["ee_w1"] = nrm(next(keys), (ee_in, d)); p["ee_b1"] = jnp.zeros((d,))
    p["ee_w2"] = nrm(next(keys), (d, d)); p["ee_b2"] = jnp.zeros((d,))
    layers = []
    for _ in range(cfg.k):
        layers.append(dict(
            # linear_key / linear_msg / linear_query split over [x | nfe | edge_attr]
            wk_x=nrm(next(keys), (d, d)), wk_n=nrm(next(keys), (d, d)), wk_e=nrm(next(keys), (d, d)),
            bk=jnp.zeros((d,)),
            wm_x=nrm(next(keys), (d, d)), wm_n=nrm(next(keys), (d, d)), wm_e=nrm(next(keys), (d, d)),
            bm=jnp.zeros((d,)),
            wq_x=nrm(next(keys), (d, d)), wq_n=nrm(next(keys), (d, d)), bq=jnp.zeros((d,)),
            mlp_w1=nrm(next(keys), (d, d)), mlp_b1=jnp.zeros((d,)),
            mlp_w2=nrm(next(keys), (d, d)), mlp_b2=jnp.zeros((d,)),
        ))
    p["gnn_layers"] = layers
    p["Vh_w"] = nrm(next(keys), (d, d)); p["Vh_b"] = jnp.zeros((d,))
    p["Vx_w"] = nrm(next(keys), (d, d)); p["Vx_b"] = jnp.zeros((d,))
    dk = d // cfg.n_attention_head
    p["pool_wq"] = nrm(next(keys), (cfg.sent_dim, cfg.n_attention_head * dk)); p["pool_bq"] = jnp.zeros((cfg.n_attention_head * dk,))
    p["pool_wk"] = nrm(next(keys), (d, cfg.n_attention_head * dk)); p["pool_bk"] = jnp.zeros((cfg.n_attention_head * dk,))
    p["pool_wv"] = nrm(next(keys), (d, cfg.n_attention_head * dk)); p["pool_bv"] = jnp.zeros((cfg.n_attention_head * dk,))
    p["sen_fc_w"] = nrm(next(keys), (cfg.sent_dim, 1)); p["sen_fc_b"] = jnp.zeros((1,))
    p["gra_fc_w"] = nrm(next(keys), (2 * d, 1)); p["gra_fc_b"] = jnp.zeros((1,))
    return p


# ----------------------------------------------------------------------------
if __name__ == "__main__":
    cfg = SimpleNamespace(
        sent_dim=16, concept_dim=32, n_ntype=4, n_etype=6, k=2,
        head_count=4, n_attention_head=2, fc_dim=16, n_concept=50,
        self_loop=True, scale_att_wei_to_tgt=False, use_src_node_edge_count=False,
        decouple_lm_gnn=False, ablation=None, output_attentions=False,
    )
    bs, nc, n_node, E_per = 2, 2, 8, 10

    key = jax.random.PRNGKey(0)
    kp, k1, k2, k3, k4, k5, k6, k7 = jax.random.split(key, 8)
    params = init_params(kp, cfg)

    sent_vecs = jax.random.normal(k1, (bs, nc, cfg.sent_dim), jnp.float32)
    concept_ids = jax.random.randint(k2, (bs, nc, n_node), 1, cfg.n_concept + 1)
    node_type_ids = jax.random.randint(k3, (bs, nc, n_node), 0, 3).at[:, :, 0].set(3)
    node_scores = jax.random.normal(k4, (bs, nc, n_node, 1), jnp.float32)
    adj_lengths = jax.random.randint(k5, (bs, nc), 3, n_node + 1)

    n_graphs = bs * nc
    ek = jax.random.split(k6, n_graphs)
    tk = jax.random.split(k7, n_graphs)
    edge_index_list = [jax.random.randint(ek[g], (2, E_per), 0, n_node) for g in range(n_graphs)]
    edge_type_list = [jax.random.randint(tk[g], (E_per,), 0, cfg.n_etype) for g in range(n_graphs)]

    logits, scores = lm_qagnn_forward(params, cfg, sent_vecs, concept_ids, node_type_ids,
                                      node_scores, adj_lengths, edge_index_list, edge_type_list)
    logits = jax.block_until_ready(logits)
    _ = jax.block_until_ready(scores[0]); _ = jax.block_until_ready(scores[1])
    assert logits.shape == (bs, nc) and jnp.all(jnp.isfinite(logits))
    print("KERNEL_OK")
</pallas_src>

<mosaic_0001>
module attributes {stable_mosaic.version = 11 : i64} {
  func.func @_linear_kernel(%arg0: i32, %arg1: memref<32x4xbf16, #tpu.memory_space<vmem>>, %arg2: memref<4x16xbf16, #tpu.memory_space<vmem>>, %arg3: memref<1x16xf32, #tpu.memory_space<vmem>>, %arg4: memref<32x16xf32, #tpu.memory_space<vmem>>) attributes {dimension_semantics = [#tpu.dimension_semantics<parallel>], iteration_bounds = array<i64: 1>, scalar_prefetch = 0 : i64, scratch_operands = 0 : i64, tpu.core_type = #tpu.core_type<tc>, window_params = [{transform_indices = @transform_0, window_bounds = array<i64: 32, 4>}, {pipeline_mode = #tpu.pipeline_mode<synchronous>, transform_indices = @transform_1, window_bounds = array<i64: 4, 16>}, {pipeline_mode = #tpu.pipeline_mode<synchronous>, transform_indices = @transform_2, window_bounds = array<i64: 1, 16>}, {transform_indices = @transform_3, window_bounds = array<i64: 32, 16>}]} {
    %c0 = arith.constant 0 : index
    %c0_0 = arith.constant 0 : index
    %0 = vector.load %arg1[%c0, %c0_0] : memref<32x4xbf16, #tpu.memory_space<vmem>>, vector<32x4xbf16>
    %c0_1 = arith.constant 0 : index
    %c0_2 = arith.constant 0 : index
    %1 = vector.load %arg2[%c0_1, %c0_2] : memref<4x16xbf16, #tpu.memory_space<vmem>>, vector<4x16xbf16>
    %cst = arith.constant dense<0.000000e+00> : vector<32x16xf32>
    %2 = tpu.matmul %0, %1, %cst {dimension_numbers = #tpu.dot_dimension_numbers<[1], [0], [0], [1], [0, 0, 1, 1], [], []>} : vector<32x4xbf16>, vector<4x16xbf16>, vector<32x16xf32> -> vector<32x16xf32>
    %c0_3 = arith.constant 0 : index
    %c0_4 = arith.constant 0 : index
    %3 = vector.load %arg3[%c0_3, %c0_4] : memref<1x16xf32, #tpu.memory_space<vmem>>, vector<1x16xf32>
    %4 = vector.broadcast %3 : vector<1x16xf32> to vector<32x16xf32>
    %5 = arith.addf %2, %4 : vector<32x16xf32>
    %cst_5 = arith.constant 5.000000e-01 : f32
    %6 = vector.broadcast %cst_5 : f32 to vector<32x16xf32>
    %7 = arith.mulf %6, %5 : vector<32x16xf32>
    %8 = arith.mulf %5, %5 : vector<32x16xf32>
    %9 = arith.mulf %5, %8 : vector<32x16xf32>
    %cst_6 = arith.constant 4.471500e-02 : f32
    %10 = vector.broadcast %cst_6 : f32 to vector<32x16xf32>
    %11 = arith.mulf %10, %9 : vector<32x16xf32>
    %12 = arith.addf %5, %11 : vector<32x16xf32>
    %cst_7 = arith.constant 0.797884583 : f32
    %13 = vector.broadcast %cst_7 : f32 to vector<32x16xf32>
    %14 = arith.mulf %13, %12 : vector<32x16xf32>
    %15 = math.tanh %14 : vector<32x16xf32>
    %cst_8 = arith.constant 1.000000e+00 : f32
    %16 = vector.broadcast %cst_8 : f32 to vector<32x16xf32>
    %17 = arith.addf %16, %15 : vector<32x16xf32>
    %18 = arith.mulf %7, %17 : vector<32x16xf32>
    %c0_9 = arith.constant 0 : index
    %c0_10 = arith.constant 0 : index
    %19 = vector.load %arg4[%c0_9, %c0_10] : memref<32x16xf32, #tpu.memory_space<vmem>>, vector<32x16xf32>
    tpu.vector_store %arg4[%c0_9, %c0_10], %18 {strides = array<i32>} : memref<32x16xf32, #tpu.memory_space<vmem>>, vector<32x16xf32>,
    return
  }
  func.func @transform_0(%arg0: i32) -> (i32, i32) {
    %c0_i32 = arith.constant 0 : i32
    %c0_i32_0 = arith.constant 0 : i32
    return %arg0, %c0_i32 : i32, i32
  }
  func.func @transform_1(%arg0: i32) -> (i32, i32) {
    %c0_i32 = arith.constant 0 : i32
    %c0_i32_0 = arith.constant 0 : i32
    %c0_i32_1 = arith.constant 0 : i32
    return %c0_i32, %c0_i32_0 : i32, i32
  }
  func.func @transform_2(%arg0: i32) -> (i32, i32) {
    %c0_i32 = arith.constant 0 : i32
    %c0_i32_0 = arith.constant 0 : i32
    %c0_i32_1 = arith.constant 0 : i32
    return %c0_i32, %c0_i32_0 : i32, i32
  }
  func.func @transform_3(%arg0: i32) -> (i32, i32) {
    %c0_i32 = arith.constant 0 : i32
    %c0_i32_0 = arith.constant 0 : i32
    return %arg0, %c0_i32 : i32, i32
  }
}

</mosaic_0001>

<bundles_post_ra>
// kernel: tpu_custom_call.1
= control target key start
LH: loop header
LB: loop body
LE: loop exit
PB: predicated region body
PF: predicated region fallthrough
CT: control target
= control target key end

     0   :  { %vm44_vm0 = vcmask 1041408   ;;  %vm37_vm1 = vcmask 31744   ;;  %vm133_vm2 = vcmask 130048   ;;  %s211_s1 = inlined_call_operand.vmem [shape: bf16[4,16], index: 1, kind: input, shape index: {}]   ;;  %s212_s0 = inlined_call_operand.vmem [shape: bf16[32,4], index: 0, kind: input, shape index: {}]   ;;  %s213_s2 = inlined_call_operand.vmem [shape: f32[1,16], index: 2, kind: input, shape index: {}]   ;;  %s214_s3 = inlined_call_operand.vmem [shape: f32[32,16], index: 3, kind: output, shape index: {}]  }
   0x1   :  { %v19_v0 = vld [vmem:[%s211_s1] sm:$0x3]  ;;  %v158_v3 = vld [vmem:[%s212_s0 + $0x8] sm:$0xff]  }
   0x2   :  { %156 = vmatprep.subr.msk.bf16.mxu0 %vm44_vm0, %v19_v0  ;;  %v46_v1 = vsel %vm44_vm0, %v19_v0, 0  ;;  %v157_v2 = vld [vmem:[%s212_s0] sm:$0xff]  }
   0x3   :  { %151 = vmatpush3.bf16.msra.mxu0 %v46_v1  ;;  %152 = vmatprep.mubr.msk.bf16.mxu0 %vm37_vm1, %v157_v2  ;;  %v142_v4 = vld [vmem:[%s213_s2] ss:$0 sm:$0xff] }
   0x6   :  { %153 = vmatmul.mubr.msk.bf16.vlgmr.msra.gmra.mrb[0].mxu0 %vm37_vm1, %v158_v3 }
  0xd9   :  { %v154_v5 = vpop.f32.mrb[0].mxu0 }
  0xda   :  { %v91_v6 = vadd.f32 %v154_v5, %v142_v4  ;;  %v82_v7 = vpop.f32.mrb[1].mxu0 }
  0xdb   :  { %v83_v8 = vadd.f32 %v142_v4, %v82_v7  ;;  %v155_v9 = vpop.f32.mrb[2].mxu0 }
  0xdc   :  { %v103_v10 = vmul.f32 %v91_v6, %v91_v6  ;;  %v94_v11 = vadd.f32 %v155_v9, %v142_v4  ;;  %v85_v12 = vpop.f32.mrb[3].mxu0  ;;  %v99_v35 = vmul.f32 0.5, %v91_v6 }
  0xdd   :  { %v101_v13 = vmul.f32 %v83_v8, %v83_v8  ;;  %v86_v14 = vadd.f32 %v142_v4, %v85_v12  ;;  %v97_v38 = vmul.f32 0.5, %v83_v8 }
  0xde   :  { %v107_v15 = vmul.f32 %v103_v10, %v91_v6  ;;  %v104_v16 = vmul.f32 %v94_v11, %v94_v11  ;;  %v100_v42 = vmul.f32 0.5, %v94_v11 }
  0xdf   :  { %v105_v17 = vmul.f32 %v101_v13, %v83_v8  ;;  %v102_v18 = vmul.f32 %v86_v14, %v86_v14  ;;  %v98_v45 = vmul.f32 0.5, %v86_v14 }
  0xe0   :  { %v111_v19 = vmul.f32 0.044715, %v107_v15  ;;  %v108_v20 = vmul.f32 %v104_v16, %v94_v11 }
  0xe1   :  { %v109_v21 = vmul.f32 0.044715, %v105_v17  ;;  %v106_v22 = vmul.f32 %v102_v18, %v86_v14 }
  0xe2   :  { %v115_v23 = vadd.f32 %v111_v19, %v91_v6  ;;  %v112_v24 = vmul.f32 0.044715, %v108_v20 }
  0xe3   :  { %v113_v25 = vadd.f32 %v109_v21, %v83_v8  ;;  %v110_v26 = vmul.f32 0.044715, %v106_v22 }
  0xe4   :  { %v119_v27 = vmul.f32 0.7978846, %v115_v23  ;;  %v116_v28 = vadd.f32 %v112_v24, %v94_v11 }
  0xe5   :  { %v117_v29 = vmul.f32 0.7978846, %v113_v25  ;;  %v114_v30 = vadd.f32 %v110_v26, %v86_v14 }
  0xe6   :  { %159 = vtanh.f32 %v119_v27  ;;  %v120_v31 = vmul.f32 0.7978846, %v116_v28 }
  0xe7   :  { %161 = vtanh.f32 %v117_v29  ;;  %v118_v32 = vmul.f32 0.7978846, %v114_v30 }
  0xe8   :  { %163 = vtanh.f32 %v120_v31 }
  0xe9   :  { %165 = vtanh.f32 %v118_v32 }
  0xf0   :  { %v160_v33 = vpop.eup %159 }
  0xf1   :  { %v162_v34 = vpop.eup %161  ;;  %v127_v36 = vadd.f32 1.0, %v160_v33 }
  0xf2   :  { %v164_v37 = vpop.eup %163  ;;  %v125_v39 = vadd.f32 1.0, %v162_v34 }
  0xf3   :  { %v166_v40 = vpop.eup %165  ;;  %v131_v41 = vmul.f32 %v127_v36, %v99_v35  ;;  %v128_v43 = vadd.f32 1.0, %v164_v37 }
  0xf4   :  { %v129_v44 = vmul.f32 %v125_v39, %v97_v38  ;;  %v126_v46 = vadd.f32 1.0, %v166_v40 }
  0xf5   :  { %136 = vst.msk [vmem:[%s214_s3 + $0x10] sm:$0xff] %vm133_vm2, %v131_v41  ;;  %v132_v47 = vmul.f32 %v128_v43, %v100_v42 }
  0xf6   :  { %134 = vst.msk [vmem:[%s214_s3] sm:$0xff] %vm133_vm2, %v129_v44  ;;  %v130_v48 = vmul.f32 %v126_v46, %v98_v45 }
  0xf7   :  { %137 = vst.msk [vmem:[%s214_s3 + $0x18] sm:$0xff] %vm133_vm2, %v132_v47 }
  0xf8   :  { %135 = vst.msk [vmem:[%s214_s3 + $0x8] sm:$0xff] %vm133_vm2, %v130_v48 }

</bundles_post_ra>
